<compile_context>
chip_gen: v6e
topology: v6e:2x2x1
jax: 0.10.0
libtpu: 0.0.40
codegen_flags: <defaults>
</compile_context>

<pallas_src>
import functools

import jax
import jax.numpy as jnp
from jax import lax
from jax.experimental import pallas as pl
from jax.experimental.pallas import tpu as pltpu


_LANE = 128
_MAX_TILE_ROWS = 2048   # 2048 x 128 x 4 B = 1 MiB per f32 block per array


def _fmix32(x):
    """murmur3 32-bit finalizer: bijective integer mixer (uint32 -> uint32)."""
    x = x ^ (x >> 16)
    x = x * jnp.uint32(0x85EBCA6B)
    x = x ^ (x >> 13)
    x = x * jnp.uint32(0xC2B2AE35)
    x = x ^ (x >> 16)
    return x


def _dropout_kernel(img_ref, cov_ref, out_ref, *, threshold, seed_mix):
    tile_r, lane = img_ref.shape
    i = pl.program_id(0)
    # Global element index of every slot in this block (counter-based PRNG, so
    # the random mask does not depend on the tile size / grid layout).
    r = lax.broadcasted_iota(jnp.int32, (tile_r, lane), 0)
    c = lax.broadcasted_iota(jnp.int32, (tile_r, lane), 1)
    idx = (i * tile_r + r) * lane + c
    bits = _fmix32(idx.astype(jnp.uint32) + jnp.uint32(seed_mix))
    # Integer-domain compare; equivalent to (uniform[0,1) > prob).
    take_cover = bits > jnp.uint32(threshold)
    out_ref[...] = jnp.where(take_cover, cov_ref[...], img_ref[...])


def dropout_noise(image, cover_image, prob, seed=0):
    """Pallas equivalent of Dropout(prob)((image, cover_image))."""
    assert image.shape == cover_image.shape
    orig_shape = image.shape
    dtype = image.dtype

    n = image.size
    rows = -(-n // _LANE)            # ceil(n / 128)
    pad = rows * _LANE - n

    img_flat = image.reshape(-1)
    cov_flat = cover_image.reshape(-1)
    if pad:  # ragged tail (rare for image tensors); pad once, slice once at the end
        img_flat = jnp.pad(img_flat, (0, pad))
        cov_flat = jnp.pad(cov_flat, (0, pad))
    img2d = img_flat.reshape(rows, _LANE)
    cov2d = cov_flat.reshape(rows, _LANE)

    # Tile rows: full array if small, else 2048-row (1 MiB f32) pipelined blocks.
    tile_r = rows if rows <= _MAX_TILE_ROWS else _MAX_TILE_ROWS
    grid = (-(-rows // tile_r),)

    # Integer threshold: P(bits > thr) = (2^32 - 1 - thr) / 2^32 ~= 1 - prob.
    # Clamping makes prob<=0 -> (almost) always cover and prob>=1 -> always image,
    # matching torch.where(rand() > prob, cover, image) exactly at the endpoints.
    threshold = int(float(prob) * 4294967296.0)
    threshold = max(0, min(threshold, 4294967295))
    seed_mix = (int(seed) * 0x9E3779B9) & 0xFFFFFFFF

    out2d = pl.pallas_call(
        functools.partial(_dropout_kernel, threshold=threshold, seed_mix=seed_mix),
        out_shape=jax.ShapeDtypeStruct((rows, _LANE), dtype),
        grid=grid,
        in_specs=[
            pl.BlockSpec((tile_r, _LANE), lambda i: (i, 0)),
            pl.BlockSpec((tile_r, _LANE), lambda i: (i, 0)),
        ],
        out_specs=pl.BlockSpec((tile_r, _LANE), lambda i: (i, 0)),
        compiler_params=pltpu.CompilerParams(
            dimension_semantics=("parallel",)),
    )(img2d, cov2d)

    out_flat = out2d.reshape(-1)
    if pad:
        out_flat = out_flat[:n]
    return out_flat.reshape(orig_shape)


if __name__ == "__main__":
    key = jax.random.PRNGKey(0)
    k_img, k_cov = jax.random.split(key)

    # NCHW, small shapes consistent with the module's image inputs.
    x_shape = (2, 4, 16, 16)
    image = jax.random.normal(k_img, x_shape, dtype=jnp.float32)
    cover = jax.random.normal(k_cov, x_shape, dtype=jnp.float32)

    prob = 0.3
    out = dropout_noise(image, cover, prob, seed=0)
    out = jax.block_until_ready(out)

    # Sanity: every output element must come from either image or cover.
    from_img = out == image
    from_cov = out == cover
    assert out.shape == x_shape
    assert bool(jnp.all(from_img | from_cov))

    # Statistical sanity: fraction taken from cover should be ~ (1 - prob).
    frac_cov = float(jnp.mean(from_cov.astype(jnp.float32)))
    assert 0.55 <= frac_cov <= 0.85, frac_cov

    print("KERNEL_OK")
</pallas_src>

<mosaic_0001>
module attributes {stable_mosaic.version = 11 : i64} {
  func.func @_dropout_kernel(%arg0: i32, %arg1: memref<16x128xf32, #tpu.memory_space<vmem>>, %arg2: memref<16x128xf32, #tpu.memory_space<vmem>>, %arg3: memref<16x128xf32, #tpu.memory_space<vmem>>) attributes {dimension_semantics = [#tpu.dimension_semantics<parallel>], iteration_bounds = array<i64: 1>, scalar_prefetch = 0 : i64, scratch_operands = 0 : i64, tpu.core_type = #tpu.core_type<tc>, window_params = [{transform_indices = @transform_0, window_bounds = array<i64: 16, 128>}, {transform_indices = @transform_1, window_bounds = array<i64: 16, 128>}, {transform_indices = @transform_2, window_bounds = array<i64: 16, 128>}]} {
    %0 = tpu.iota {dimensions = array<i32: 0>} : vector<16x128xi32>
    %1 = tpu.iota {dimensions = array<i32: 1>} : vector<16x128xi32>
    %c16_i32 = arith.constant 16 : i32
    %2 = arith.muli %arg0, %c16_i32 : i32
    %3 = vector.broadcast %2 : i32 to vector<16x128xi32>
    %4 = arith.addi %3, %0 : vector<16x128xi32>
    %c128_i32 = arith.constant 128 : i32
    %5 = vector.broadcast %c128_i32 : i32 to vector<16x128xi32>
    %6 = arith.muli %4, %5 : vector<16x128xi32>
    %7 = arith.addi %6, %1 : vector<16x128xi32>
    %c0_i32 = arith.constant 0 : i32
    %8 = vector.broadcast %c0_i32 : i32 to vector<16x128xi32>
    %9 = arith.addi %7, %8 : vector<16x128xi32>
    %c16_i32_0 = arith.constant 16 : i32
    %10 = vector.broadcast %c16_i32_0 : i32 to vector<16x128xi32>
    %11 = arith.shrui %9, %10 : vector<16x128xi32>
    %12 = arith.xori %9, %11 : vector<16x128xi32>
    %c-2048144789_i32 = arith.constant -2048144789 : i32
    %13 = vector.broadcast %c-2048144789_i32 : i32 to vector<16x128xi32>
    %14 = arith.muli %12, %13 : vector<16x128xi32>
    %c13_i32 = arith.constant 13 : i32
    %15 = vector.broadcast %c13_i32 : i32 to vector<16x128xi32>
    %16 = arith.shrui %14, %15 : vector<16x128xi32>
    %17 = arith.xori %14, %16 : vector<16x128xi32>
    %c-1028477387_i32 = arith.constant -1028477387 : i32
    %18 = vector.broadcast %c-1028477387_i32 : i32 to vector<16x128xi32>
    %19 = arith.muli %17, %18 : vector<16x128xi32>
    %c16_i32_1 = arith.constant 16 : i32
    %20 = vector.broadcast %c16_i32_1 : i32 to vector<16x128xi32>
    %21 = arith.shrui %19, %20 : vector<16x128xi32>
    %22 = arith.xori %19, %21 : vector<16x128xi32>
    %c1288490188_i32 = arith.constant 1288490188 : i32
    %23 = vector.broadcast %c1288490188_i32 : i32 to vector<16x128xi32>
    %24 = arith.cmpi ugt, %22, %23 : vector<16x128xi32>
    %c0 = arith.constant 0 : index
    %c0_2 = arith.constant 0 : index
    %25 = vector.load %arg2[%c0, %c0_2] : memref<16x128xf32, #tpu.memory_space<vmem>>, vector<16x128xf32>
    %c0_3 = arith.constant 0 : index
    %c0_4 = arith.constant 0 : index
    %26 = vector.load %arg1[%c0_3, %c0_4] : memref<16x128xf32, #tpu.memory_space<vmem>>, vector<16x128xf32>
    %27 = arith.select %24, %25, %26 : vector<16x128xi1>, vector<16x128xf32>
    %c0_5 = arith.constant 0 : index
    %c0_6 = arith.constant 0 : index
    %28 = vector.load %arg3[%c0_5, %c0_6] : memref<16x128xf32, #tpu.memory_space<vmem>>, vector<16x128xf32>
    tpu.vector_store %arg3[%c0_5, %c0_6], %27 {strides = array<i32>} : memref<16x128xf32, #tpu.memory_space<vmem>>, vector<16x128xf32>,
    return
  }
  func.func @transform_0(%arg0: i32) -> (i32, i32) {
    %c0_i32 = arith.constant 0 : i32
    %c0_i32_0 = arith.constant 0 : i32
    return %arg0, %c0_i32 : i32, i32
  }
  func.func @transform_1(%arg0: i32) -> (i32, i32) {
    %c0_i32 = arith.constant 0 : i32
    %c0_i32_0 = arith.constant 0 : i32
    return %arg0, %c0_i32 : i32, i32
  }
  func.func @transform_2(%arg0: i32) -> (i32, i32) {
    %c0_i32 = arith.constant 0 : i32
    %c0_i32_0 = arith.constant 0 : i32
    return %arg0, %c0_i32 : i32, i32
  }
}

</mosaic_0001>

<bundles_post_ra>
// kernel: tpu_custom_call.1
= control target key start
LH: loop header
LB: loop body
LE: loop exit
PB: predicated region body
PF: predicated region fallthrough
CT: control target
= control target key end

     0   :  { %7 = vsyncpa [#allocation3], 0  ;;  %s206_s0 = inlined_call_operand.hbm [shape: f32[16,128], index: 0, kind: input, shape index: {}]   ;;  %s207_s1 = inlined_call_operand.hbm [shape: f32[16,128], index: 1, kind: input, shape index: {}]   ;;  %s208_s2 = inlined_call_operand.hbm [shape: f32[16,128], index: 2, kind: output, shape index: {}]  }
   0x1   :  { %8 = vsyncpa [#allocation6], 0 }
   0x2   :  { %9 = vsyncpa [#allocation4], 0  ;;  %s168_s9 = smov [#allocation2]  }
   0x3   :  { %s15_s10 = sshll.u32 %s168_s9, 4  ;;  %s16_s10 = int_to_ptr.vmem [resolvable:$true] %s15_s10 }
   0x4   :  { %s110_s11 = scalar_lea.vmem %s16_s10, 256  ;;  %p115_p1 = scmp.lt.s32.totalorder %s16_s10, %s16_s10 }
   0x5   :  { %p111_p0 = scmp.ne.s32.totalorder %s16_s10, %s110_s11  ;;  %p116_p2 = scmp.lt.s32.totalorder %s110_s11, %s110_s11 }
   0x7   :  { %p117_p3 = por %p116_p2, %p115_p1 }
   0x9   :  { %p118_p4 = pnand %p117_p3, %p111_p0 }
   0xb   :  { %121 = shalt.err (!%p118_p4)
}
   0xc   :  { %s169_s12 = smov 128   ;;  %s170_s13 = smov 8  }
   0xd   :  { %21 = dma.hbm_to_vmem [thread:$0]  %s206_s0, 256, %s16_s10, [#allocation3], %s169_s12, %s169_s12, %s170_s13  }
   0xe   :  { %s171_s16 = smov [#allocation5]  }
   0xf   :  { %s27_s17 = sshll.u32 %s171_s16, 4  ;;  %s28_s17 = int_to_ptr.vmem [resolvable:$true] %s27_s17 }
  0x10   :  { %s130_s18 = scalar_lea.vmem %s28_s17, 256  ;;  %p135_p6 = scmp.lt.s32.totalorder %s28_s17, %s28_s17 }
  0x11   :  { %p131_p5 = scmp.ne.s32.totalorder %s28_s17, %s130_s18  ;;  %p136_p7 = scmp.lt.s32.totalorder %s130_s18, %s130_s18 }
  0x13   :  { %p137_p8 = por %p136_p7, %p135_p6 }
  0x15   :  { %p138_p9 = pnand %p137_p8, %p131_p5 }
  0x17   :  { %141 = shalt.err (!%p138_p9)
}
  0x18   :  { %33 = dma.hbm_to_vmem [thread:$0]  %s207_s1, 256, %s28_s17, [#allocation6], %s169_s12, %s169_s12, %s170_s13  }
  0x19   :  { %162 = dma.done.wait [#allocation3], 256  }
  0x1a   :  { %163 = vsyncadd [#allocation3], 4294967040 }
  0x1b   :  { %164 = dma.done.wait [#allocation6], 256  }
  0x1c   :  { %165 = vsyncadd [#allocation6], 4294967040  ;;  %v40_v0 = vlaneseq  ;;  %v71_v22 = vld [vmem:[#allocation5] sm:$0xff]  ;;  %v73_v23 = vld [vmem:[#allocation2] sm:$0xff]  ;;  %s172_s0 = smov [#allocation7]  }
  0x1d   :  { %s84_s1 = sshll.u32 %s172_s0, 4  ;;  %v72_v26 = vld [vmem:[#allocation5 + $0x8] sm:$0xff]  ;;  %v74_v27 = vld [vmem:[#allocation2 + $0x8] sm:$0xff]  ;;  %s85_s1 = int_to_ptr.vmem [resolvable:$true] %s84_s1 }
  0x1e   :  { %v41_v1 = vshrl.u32 %v40_v0, 7  ;;  %v44_v2 = vand.u32 127, %v40_v0  ;;  %s142_s21 = scalar_lea.vmem %s85_s1, 256  ;;  %p147_p11 = scmp.lt.s32.totalorder %s85_s1, %s85_s1 }
  0x1f   :  { %p143_p10 = scmp.ne.s32.totalorder %s85_s1, %s142_s21  ;;  %p148_p12 = scmp.lt.s32.totalorder %s142_s21, %s142_s21 }
  0x20   :  { %v49_v3 = vmul.u32 128, %v41_v1  ;;  %v42_v4 = vadd.s32 8, %v41_v1 }
  0x21   :  { %p149_p13 = por %p148_p12, %p147_p11 }
  0x22   :  { %v51_v5 = vadd.s32 %v49_v3, %v44_v2  ;;  %v50_v6 = vmul.u32 128, %v42_v4 }
  0x23   :  { %p150_p0 = pnand %p149_p13, %p143_p10 }
  0x24   :  { %v53_v7 = vshrl.u32 %v51_v5, 16  ;;  %v52_v8 = vadd.s32 %v50_v6, %v44_v2 }
  0x26   :  { %v55_v9 = vxor.u32 %v53_v7, %v51_v5  ;;  %v54_v10 = vshrl.u32 %v52_v8, 16 }
  0x28   :  { %v57_v11 = vmul.u32 2246822507, %v55_v9  ;;  %v56_v12 = vxor.u32 %v54_v10, %v52_v8 }
  0x2a   :  { %v59_v13 = vshrl.u32 %v57_v11, 13  ;;  %v58_v14 = vmul.u32 2246822507, %v56_v12 }
  0x2c   :  { %v61_v15 = vxor.u32 %v59_v13, %v57_v11  ;;  %v60_v16 = vshrl.u32 %v58_v14, 13 }
  0x2e   :  { %v63_v17 = vmul.u32 3266489909, %v61_v15  ;;  %v62_v18 = vxor.u32 %v60_v16, %v58_v14 }
  0x30   :  { %v65_v19 = vshrl.u32 %v63_v17, 16  ;;  %v64_v20 = vmul.u32 3266489909, %v62_v18 }
  0x32   :  { %v67_v21 = vxor.u32 %v65_v19, %v63_v17  ;;  %v66_v24 = vshrl.u32 %v64_v20, 16 }
  0x34   :  { %vm69_vm0 = vcmp.gt.u32.totalorder %v67_v21, 1288490188  ;;  %v68_v25 = vxor.u32 %v66_v24, %v64_v20 }
  0x35   :  { %v75_v28 = vsel %vm69_vm0, %v71_v22, %v73_v23 }
  0x36   :  { %77 = vst [vmem:[#allocation7] sm:$0xff] %v75_v28  ;;  %vm70_vm1 = vcmp.gt.u32.totalorder %v68_v25, 1288490188 }
  0x37   :  { %v76_v29 = vsel %vm70_vm1, %v72_v26, %v74_v27 }
  0x38   :  { %78 = vst [vmem:[#allocation7 + $0x8] sm:$0xff] %v76_v29 }
  0x39   :  { %153 = shalt.err (!%p150_p0)
}
  0x3a   :  { %90 = dma.vmem_to_hbm [thread:$0]  %s85_s1, 256, %s208_s2, [#allocation4], %s169_s12, %s169_s12, %s170_s13  }
  0x3b   :  { %166 = dma.done.wait [#allocation4], 256  }
  0x3c   :  { %167 = vsyncadd [#allocation4], 4294967040 }
  0x3d   :  { %94 = vsyncpa [#allocation3], 1 }
  0x3e   :  { %95 = vsyncpa [#allocation6], 1 }
  0x3f   :  { %96 = vsyncpa [#allocation4], 1 }

</bundles_post_ra>
